<compile_context>
chip_gen: v7x
topology: tpu7x:2x2x1
jax: 0.10.0
libtpu: 0.0.40
codegen_flags: <defaults>
</compile_context>

<pallas_src>
import jax
import jax.numpy as jnp
from jax.experimental import pallas as pl
from jax.experimental.pallas import tpu as pltpu


def foonet_kernel(x_ref, w0_ref, w1_ref, w2_ref, o_ref):
    # x_ref: (tb, N) f32 ; w*_ref: (N, N) bf16 in (in, out) layout ; o_ref: (tb, N) f32.
    # Note: if B is not a multiple of tb, the trailing partial block computes on
    # padded rows; that is safe only because Pallas masks the out-of-range
    # output writes - do not read those rows for anything else.
    h = x_ref[...].astype(jnp.bfloat16)          # narrow on the VPU, not in the wrapper
    acc = None
    for w_ref in (w0_ref, w1_ref, w2_ref):
        # y = h @ W  with W already (in, out): MXU-natural, no XLU transpose.
        acc = jnp.dot(h, w_ref[...], preferred_element_type=jnp.float32)
        acc = jnp.maximum(acc, 0.0)              # ReLU in f32 (v5e-safe VPU path)
        h = acc.astype(jnp.bfloat16)             # narrow only the next MXU input
    o_ref[...] = acc.astype(o_ref.dtype)


def prepare_foonet_weights(w0, w1, w2):
    """One-time init-path prep: torch (out, in) f32 -> (in, out) bf16."""
    return tuple(w.T.astype(jnp.bfloat16) for w in (w0, w1, w2))


def foonet_forward(x, w0_t, w1_t, w2_t, *, tile_b=None, out_dtype=jnp.float32):
    """x: (B, N) f32 ; w*_t: (N, N) bf16, already transposed to (in, out)."""
    B, N = x.shape

    # Single grid step by default: whole problem fits trivially in VMEM.
    tb = B if tile_b is None else min(tile_b, B)
    if tb % 8 != 0:                 # keep the sublane constraint; full extent is always legal
        tb = B
    grid_steps = pl.cdiv(B, tb)

    layers = 3
    cost = pl.CostEstimate(
        flops=2 * B * N * N * layers,
        transcendentals=0,
        bytes_accessed=(B * N * 4              # x (f32 in)
                        + layers * N * N * 2   # weights (bf16, resident)
                        + B * N * jnp.dtype(out_dtype).itemsize),
    )

    # Weights: constant index_map -> DMA'd once, resident across the batch grid.
    # For the scaled-up (grid > 1) case, single-buffer them so their second
    # pipeline buffer is freed and they stay pinned.
    if grid_steps > 1:
        w_spec = pl.BlockSpec((N, N), lambda i: (0, 0), pipeline_mode=pl.Buffered(1))
    else:
        w_spec = pl.BlockSpec((N, N), lambda i: (0, 0))

    return pl.pallas_call(
        foonet_kernel,
        out_shape=jax.ShapeDtypeStruct((B, N), out_dtype),
        grid_spec=pltpu.PrefetchScalarGridSpec(
            num_scalar_prefetch=0,
            grid=(grid_steps,),
            in_specs=[
                pl.BlockSpec((tb, N), lambda i: (i, 0)),   # x tile over batch
                w_spec,                                     # W0 (resident)
                w_spec,                                     # W1 (resident)
                w_spec,                                     # W2 (resident)
            ],
            out_specs=pl.BlockSpec((tb, N), lambda i: (i, 0)),
        ),
        compiler_params=pltpu.CompilerParams(
            dimension_semantics=("parallel",),   # only matters once grid > 1
        ),
        cost_estimate=cost,
    )(x, w0_t, w1_t, w2_t)


def foonet_reference(x, w0, w1, w2):
    h = x
    for w in (w0, w1, w2):
        h = jnp.maximum(h @ w.T, 0.0)
    return h


if __name__ == "__main__":
    # Shapes consistent with FooNet(neural_num=128, layers=3).
    batch = 256
    neural_num = 128

    key = jax.random.PRNGKey(0)
    kx, k0, k1, k2 = jax.random.split(key, 4)

    x = jax.random.normal(kx, (batch, neural_num), dtype=jnp.float32)
    # Deterministic kaiming-uniform-ish init for nn.Linear(N, N, bias=False): (out, in)
    bound = 1.0 / (neural_num ** 0.5)
    w0 = jax.random.uniform(k0, (neural_num, neural_num), jnp.float32, -bound, bound)
    w1 = jax.random.uniform(k1, (neural_num, neural_num), jnp.float32, -bound, bound)
    w2 = jax.random.uniform(k2, (neural_num, neural_num), jnp.float32, -bound, bound)

    # One-time init-path weight prep (outside the per-call hot path).
    w0_t, w1_t, w2_t = prepare_foonet_weights(w0, w1, w2)
    w0_t, w1_t, w2_t = jax.block_until_ready((w0_t, w1_t, w2_t))

    out = foonet_forward(x, w0_t, w1_t, w2_t)
    out = jax.block_until_ready(out)

    ref = foonet_reference(x, w0, w1, w2)
    assert out.shape == (batch, neural_num)
    # bf16 MXU inputs (f32 accumulation) over 3 layers -> ~1e-2-level deviation
    # vs the f32 reference; tolerance absorbs that.
    assert jnp.allclose(out, ref, atol=5e-2, rtol=5e-2), "mismatch vs reference"

    print("KERNEL_OK")
</pallas_src>

<mosaic_0001>
module attributes {stable_mosaic.version = 11 : i64} {
  func.func @foonet_kernel(%arg0: i32, %arg1: memref<256x128xf32, #tpu.memory_space<vmem>>, %arg2: memref<128x128xbf16, #tpu.memory_space<vmem>>, %arg3: memref<128x128xbf16, #tpu.memory_space<vmem>>, %arg4: memref<128x128xbf16, #tpu.memory_space<vmem>>, %arg5: memref<256x128xf32, #tpu.memory_space<vmem>>) attributes {dimension_semantics = [#tpu.dimension_semantics<parallel>], iteration_bounds = array<i64: 1>, scalar_prefetch = 0 : i64, scratch_operands = 0 : i64, tpu.core_type = #tpu.core_type<tc>, window_params = [{transform_indices = @transform_0, window_bounds = array<i64: 256, 128>}, {pipeline_mode = #tpu.pipeline_mode<synchronous>, transform_indices = @transform_1, window_bounds = array<i64: 128, 128>}, {pipeline_mode = #tpu.pipeline_mode<synchronous>, transform_indices = @transform_2, window_bounds = array<i64: 128, 128>}, {pipeline_mode = #tpu.pipeline_mode<synchronous>, transform_indices = @transform_3, window_bounds = array<i64: 128, 128>}, {transform_indices = @transform_4, window_bounds = array<i64: 256, 128>}]} {
    %c0 = arith.constant 0 : index
    %c0_0 = arith.constant 0 : index
    %0 = vector.load %arg1[%c0, %c0_0] : memref<256x128xf32, #tpu.memory_space<vmem>>, vector<256x128xf32>
    %1 = arith.truncf %0 : vector<256x128xf32> to vector<256x128xbf16>
    %c0_1 = arith.constant 0 : index
    %c0_2 = arith.constant 0 : index
    %2 = vector.load %arg2[%c0_1, %c0_2] : memref<128x128xbf16, #tpu.memory_space<vmem>>, vector<128x128xbf16>
    %cst = arith.constant dense<0.000000e+00> : vector<256x128xf32>
    %3 = tpu.matmul %1, %2, %cst {dimension_numbers = #tpu.dot_dimension_numbers<[1], [0], [0], [1], [0, 0, 1, 1], [], []>} : vector<256x128xbf16>, vector<128x128xbf16>, vector<256x128xf32> -> vector<256x128xf32>
    %cst_3 = arith.constant 0.000000e+00 : f32
    %4 = vector.broadcast %cst_3 : f32 to vector<256x128xf32>
    %5 = arith.maximumf %3, %4 : vector<256x128xf32>
    %6 = arith.truncf %5 : vector<256x128xf32> to vector<256x128xbf16>
    %c0_4 = arith.constant 0 : index
    %c0_5 = arith.constant 0 : index
    %7 = vector.load %arg3[%c0_4, %c0_5] : memref<128x128xbf16, #tpu.memory_space<vmem>>, vector<128x128xbf16>
    %cst_6 = arith.constant dense<0.000000e+00> : vector<256x128xf32>
    %8 = tpu.matmul %6, %7, %cst_6 {dimension_numbers = #tpu.dot_dimension_numbers<[1], [0], [0], [1], [0, 0, 1, 1], [], []>} : vector<256x128xbf16>, vector<128x128xbf16>, vector<256x128xf32> -> vector<256x128xf32>
    %cst_7 = arith.constant 0.000000e+00 : f32
    %9 = vector.broadcast %cst_7 : f32 to vector<256x128xf32>
    %10 = arith.maximumf %8, %9 : vector<256x128xf32>
    %11 = arith.truncf %10 : vector<256x128xf32> to vector<256x128xbf16>
    %c0_8 = arith.constant 0 : index
    %c0_9 = arith.constant 0 : index
    %12 = vector.load %arg4[%c0_8, %c0_9] : memref<128x128xbf16, #tpu.memory_space<vmem>>, vector<128x128xbf16>
    %cst_10 = arith.constant dense<0.000000e+00> : vector<256x128xf32>
    %13 = tpu.matmul %11, %12, %cst_10 {dimension_numbers = #tpu.dot_dimension_numbers<[1], [0], [0], [1], [0, 0, 1, 1], [], []>} : vector<256x128xbf16>, vector<128x128xbf16>, vector<256x128xf32> -> vector<256x128xf32>
    %cst_11 = arith.constant 0.000000e+00 : f32
    %14 = vector.broadcast %cst_11 : f32 to vector<256x128xf32>
    %15 = arith.maximumf %13, %14 : vector<256x128xf32>
    %c0_12 = arith.constant 0 : index
    %c0_13 = arith.constant 0 : index
    %16 = vector.load %arg5[%c0_12, %c0_13] : memref<256x128xf32, #tpu.memory_space<vmem>>, vector<256x128xf32>
    tpu.vector_store %arg5[%c0_12, %c0_13], %15 {strides = array<i32>} : memref<256x128xf32, #tpu.memory_space<vmem>>, vector<256x128xf32>,
    return
  }
  func.func @transform_0(%arg0: i32) -> (i32, i32) {
    %c0_i32 = arith.constant 0 : i32
    %c0_i32_0 = arith.constant 0 : i32
    return %arg0, %c0_i32 : i32, i32
  }
  func.func @transform_1(%arg0: i32) -> (i32, i32) {
    %c0_i32 = arith.constant 0 : i32
    %c0_i32_0 = arith.constant 0 : i32
    %c0_i32_1 = arith.constant 0 : i32
    return %c0_i32, %c0_i32_0 : i32, i32
  }
  func.func @transform_2(%arg0: i32) -> (i32, i32) {
    %c0_i32 = arith.constant 0 : i32
    %c0_i32_0 = arith.constant 0 : i32
    %c0_i32_1 = arith.constant 0 : i32
    return %c0_i32, %c0_i32_0 : i32, i32
  }
  func.func @transform_3(%arg0: i32) -> (i32, i32) {
    %c0_i32 = arith.constant 0 : i32
    %c0_i32_0 = arith.constant 0 : i32
    %c0_i32_1 = arith.constant 0 : i32
    return %c0_i32, %c0_i32_0 : i32, i32
  }
  func.func @transform_4(%arg0: i32) -> (i32, i32) {
    %c0_i32 = arith.constant 0 : i32
    %c0_i32_0 = arith.constant 0 : i32
    return %arg0, %c0_i32 : i32, i32
  }
}

</mosaic_0001>

<bundles_post_ra>
// kernel: tpu_custom_call.1
= control target key start
LH: loop header
LB: loop body
LE: loop exit
PB: predicated region body
PF: predicated region fallthrough
CT: control target
= control target key end

     0   :  { %9 = vsyncpa [#allocation3], 0  ;;  %s1505_s0 = inlined_call_operand.hbm [shape: f32[256,128], index: 0, kind: input, shape index: {}]   ;;  %s1506_s1 = inlined_call_operand.hbm [shape: bf16[128,128], index: 1, kind: input, shape index: {}]   ;;  %s1507_s2 = inlined_call_operand.hbm [shape: bf16[128,128], index: 2, kind: input, shape index: {}]   ;;  %s1508_s3 = inlined_call_operand.hbm [shape: bf16[128,128], index: 3, kind: input, shape index: {}]   ;;  %s1509_s4 = inlined_call_operand.hbm [shape: f32[256,128], index: 4, kind: output, shape index: {}]  }
   0x1   :  { %10 = vsyncpa [#allocation6], 0 }
   0x2   :  { %11 = vsyncpa [#allocation9], 0 }
   0x3   :  { %12 = vsyncpa [#allocation4], 0  ;;  %s1383_s15 = smov [#allocation5]   ;;  %s1265_s19 = scalar_lea.hbm %s1506_s1, 1024 }
   0x4   :  { %s30_s16 = sshll.u32 %s1383_s15, 4  ;;  %p1266_p0 = scmp.ne.s32.totalorder %s1506_s1, %s1265_s19  ;;  %s31_s16 = int_to_ptr.vmem [resolvable:$true] %s30_s16 }
   0x5   :  { %p1269_p1 = scmp.lt.u32.totalorder %s1265_s19, %s1506_s1 }
   0x7   :  { %p1271_p2 = pnand %p1269_p1, %p1266_p0 }
   0x9   :  { %1274 = shalt.err (!%p1271_p2)
}
   0xa   :  { %s1275_s24 = scalar_lea.vmem %s31_s16, 1024  ;;  %p1280_p4 = scmp.lt.s32.totalorder %s31_s16, %s31_s16 }
   0xb   :  { %p1276_p3 = scmp.ne.s32.totalorder %s31_s16, %s1275_s24  ;;  %p1281_p5 = scmp.lt.s32.totalorder %s1275_s24, %s1275_s24 }
   0xd   :  { %p1282_p6 = por %p1281_p5, %p1280_p4 }
   0xf   :  { %p1283_p7 = pnand %p1282_p6, %p1276_p3 }
  0x11   :  { %1286 = shalt.err (!%p1283_p7)
}
  0x12   :  { %s1384_s25 = smov 64   ;;  %s1385_s26 = smov 4  }
  0x13   :  { %36 = dma.hbm_to_vmem [thread:$0]  %s1506_s1, 1024, %s31_s16, [#allocation6], %s1384_s25, %s1384_s25, %s1385_s26  }
  0x14   :  { %s1386_s29 = smov [#allocation2]   ;;  %s1287_s7 = scalar_lea.hbm %s1505_s0, 4096 }
  0x15   :  { %s18_s30 = sshll.u32 %s1386_s29, 4  ;;  %p1288_p8 = scmp.ne.s32.totalorder %s1505_s0, %s1287_s7  ;;  %s19_s30 = int_to_ptr.vmem [resolvable:$true] %s18_s30 }
  0x16   :  { %p1291_p9 = scmp.lt.u32.totalorder %s1287_s7, %s1505_s0 }
  0x18   :  { %p1293_p10 = pnand %p1291_p9, %p1288_p8 }
  0x1a   :  { %1296 = shalt.err (!%p1293_p10)
}
  0x1b   :  { %s1297_s12 = scalar_lea.vmem %s19_s30, 4096  ;;  %p1302_p12 = scmp.lt.s32.totalorder %s19_s30, %s19_s30 }
  0x1c   :  { %p1298_p11 = scmp.ne.s32.totalorder %s19_s30, %s1297_s12  ;;  %p1303_p13 = scmp.lt.s32.totalorder %s1297_s12, %s1297_s12 }
  0x1e   :  { %p1304_p0 = por %p1303_p13, %p1302_p12 }
  0x20   :  { %p1305_p1 = pnand %p1304_p0, %p1298_p11 }
  0x22   :  { %1308 = shalt.err (!%p1305_p1)
}
  0x23   :  { %s1387_s1 = smov 128   ;;  %s1388_s13 = smov 8  }
  0x24   :  { %24 = dma.hbm_to_vmem [thread:$0]  %s1505_s0, 4096, %s19_s30, [#allocation3], %s1387_s1, %s1387_s1, %s1388_s13  }
  0x25   :  { %s1389_s16 = smov [#allocation7]   ;;  %s1390_s18 = smov [#allocation8]  }
  0x26   :  { %s42_s17 = sshll.u32 %s1389_s16, 4  ;;  %s54_s19 = sshll.u32 %s1390_s18, 4  ;;  %s43_s17 = int_to_ptr.vmem [resolvable:$true] %s42_s17  ;;  %s1447_s19 = int_to_ptr.vmem [resolvable:$true] %s54_s19 }
  0x27   :  { %s1309_s22 = scalar_lea.hbm %s1507_s2, 1024 }
  0x28   :  { %p1310_p2 = scmp.ne.s32.totalorder %s1507_s2, %s1309_s22  ;;  %p1313_p3 = scmp.lt.u32.totalorder %s1309_s22, %s1507_s2 }
  0x2a   :  { %p1315_p4 = pnand %p1313_p3, %p1310_p2 }
  0x2c   :  { %1318 = shalt.err (!%p1315_p4)
}
  0x2d   :  { %s1319_s0 = scalar_lea.vmem %s43_s17, 1024  ;;  %p1324_p6 = scmp.lt.s32.totalorder %s43_s17, %s43_s17 }
  0x2e   :  { %p1320_p5 = scmp.ne.s32.totalorder %s43_s17, %s1319_s0  ;;  %p1325_p7 = scmp.lt.s32.totalorder %s1319_s0, %s1319_s0 }
  0x30   :  { %p1326_p8 = por %p1325_p7, %p1324_p6 }
  0x32   :  { %p1327_p9 = pnand %p1326_p8, %p1320_p5 }
  0x34   :  { %1330 = shalt.err (!%p1327_p9)
}
  0x35   :  { %48 = dma.hbm_to_vmem [thread:$0]  %s1507_s2, 1024, %s43_s17, [#allocation6], %s1384_s25, %s1384_s25, %s1385_s26  }
  0x36   :  { %s1331_s7 = scalar_lea.hbm %s1508_s3, 1024 }
  0x37   :  { %p1332_p10 = scmp.ne.s32.totalorder %s1508_s3, %s1331_s7  ;;  %p1335_p11 = scmp.lt.u32.totalorder %s1331_s7, %s1508_s3 }
  0x39   :  { %p1337_p12 = pnand %p1335_p11, %p1332_p10 }
  0x3b   :  { %1340 = shalt.err (!%p1337_p12)
}
  0x3c   :  { %s1341_s12 = scalar_lea.vmem %s1447_s19, 1024  ;;  %p1346_p0 = scmp.lt.s32.totalorder %s1447_s19, %s1447_s19 }
  0x3d   :  { %p1342_p13 = scmp.ne.s32.totalorder %s1447_s19, %s1341_s12  ;;  %p1347_p1 = scmp.lt.s32.totalorder %s1341_s12, %s1341_s12 }
  0x3f   :  { %p1348_p2 = por %p1347_p1, %p1346_p0 }
  0x41   :  { %p1349_p3 = pnand %p1348_p2, %p1342_p13 }
  0x43   :  { %1352 = shalt.err (!%p1349_p3)
}
  0x44   :  { %60 = dma.hbm_to_vmem [thread:$0]  %s1508_s3, 1024, %s1447_s19, [#allocation9], %s1384_s25, %s1384_s25, %s1385_s26  }
  0x45   :  { %1375 = dma.done.wait [#allocation3], 4096  }
  0x46   :  { %1376 = vsyncadd [#allocation3], 4294963200 }
  0x47   :  { %1377 = dma.done.wait [#allocation6], 2048  }
  0x48   :  { %1378 = vsyncadd [#allocation6], 4294965248 }
  0x49   :  { %1379 = dma.done.wait [#allocation9], 1024  }
  0x4a   :  { %1380 = vsyncadd [#allocation9], 4294966272  ;;  %v1241_v0 = vld [vmem:[#allocation5] sm:$0xff]   ;;  %v1242_v1 = vld [vmem:[#allocation5 + $0x8] sm:$0xff]   ;;  %s1391_s3 = smov [#allocation10]  }
  0x4b   :  { %1072 = vmatprep.subr.bf16.mxu0 %v1241_v0  ;;  %1216 = vmatprep.subr.bf16.mxu1 %v1241_v0  ;;  %v1243_v2 = vld [vmem:[#allocation5 + $0x10] sm:$0xff]   ;;  %v1244_v3 = vld [vmem:[#allocation5 + $0x18] sm:$0xff]   ;;  %v74_v4 = vld [vmem:[#allocation2] sm:$0xff]  ;;  %s962_s25 = sshll.u32 %s1391_s3, 4  ;;  %s963_s25 = int_to_ptr.vmem [resolvable:$true] %s962_s25 }
  0x4c   :  { %1073 = vmatpush3.bf16.msra.mxu0 %v1241_v0  ;;  %1224 = vmatpush3.bf16.msra.mxu1 %v1241_v0  ;;  %v75_v5 = vld [vmem:[#allocation2 + $0x8] sm:$0xff]  ;;  %v1245_v7 = vld [vmem:[#allocation5 + $0x20] sm:$0xff]   ;;  %v1247_v12 = vld [vmem:[#allocation5 + $0x30] sm:$0xff]   ;;  %s1353_s26 = scalar_lea.vmem %s963_s25, 4096  ;;  %p1358_p5 = scmp.lt.s32.totalorder %s963_s25, %s963_s25 }
  0x4d   :  { %1074 = vmatprep.subr.bf16.mxu0 %v1242_v1  ;;  %1217 = vmatprep.subr.bf16.mxu1 %v1242_v1  ;;  %v106_v6 = vpack.c.bf16 %v75_v5, %v74_v4  ;;  %v90_v8 = vld [vmem:[#allocation2 + $0x80] sm:$0xff]  ;;  %v91_v9 = vld [vmem:[#allocation2 + $0x88] sm:$0xff]  ;;  %v1248_v13 = vld [vmem:[#allocation5 + $0x38] sm:$0xff]   ;;  %p1354_p4 = scmp.ne.s32.totalorder %s963_s25, %s1353_s26  ;;  %p1359_p6 = scmp.lt.s32.totalorder %s1353_s26, %s1353_s26 }
  0x4e   :  { %v114_v10 = vpack.c.bf16 %v91_v9, %v90_v8  ;;  %v1246_v11 = vld [vmem:[#allocation5 + $0x28] sm:$0xff]   ;;  %v76_v14 = vld [vmem:[#allocation2 + $0x10] sm:$0xff]  ;;  %v77_v15 = vld [vmem:[#allocation2 + $0x18] sm:$0xff] }
  0x4f   :  { %1088 = vmatprep.mubr.bf16.mxu0 %v106_v6  ;;  %v78_v16 = vld [vmem:[#allocation2 + $0x20] sm:$0xff]  ;;  %v79_v17 = vld [vmem:[#allocation2 + $0x28] sm:$0xff]  ;;  %v92_v18 = vld [vmem:[#allocation2 + $0x90] sm:$0xff]  ;;  %v107_v23 = vpack.c.bf16 %v77_v15, %v76_v14  ;;  %p1360_p7 = por %p1359_p6, %p1358_p5 }
  0x50   :  { %1075 = vmatpush3.bf16.msra.mxu0 %v1242_v1  ;;  %1225 = vmatpush3.bf16.msra.mxu1 %v1242_v1  ;;  %v93_v19 = vld [vmem:[#allocation2 + $0x98] sm:$0xff]  ;;  %v94_v20 = vld [vmem:[#allocation2 + $0xa0] sm:$0xff]  ;;  %v95_v21 = vld [vmem:[#allocation2 + $0xa8] sm:$0xff]  ;;  %v108_v24 = vpack.c.bf16 %v79_v17, %v78_v16 }
  0x51   :  { %1076 = vmatprep.subr.bf16.mxu0 %v1243_v2  ;;  %1218 = vmatprep.subr.bf16.mxu1 %v1243_v2  ;;  %v1249_v22 = vld [vmem:[#allocation7] sm:$0xff]   ;;  %v115_v25 = vpack.c.bf16 %v93_v19, %v92_v18  ;;  %v116_v26 = vpack.c.bf16 %v95_v21, %v94_v20  ;;  %v1250_v27 = vld [vmem:[#allocation7 + $0x8] sm:$0xff]   ;;  %v80_v28 = vld [vmem:[#allocation2 + $0x30] sm:$0xff]  ;;  %p1361_p8 = pnand %p1360_p7, %p1354_p4 }
  0x52   :  { %1104 = vmatprep.mubr.bf16.mxu1 %v114_v10  ;;  %v81_v29 = vld [vmem:[#allocation2 + $0x38] sm:$0xff]  ;;  %v82_v30 = vld [vmem:[#allocation2 + $0x40] sm:$0xff]  ;;  %v83_v31 = vld [vmem:[#allocation2 + $0x48] sm:$0xff] }
  0x53   :  { %v96_v32 = vld [vmem:[#allocation2 + $0xb0] sm:$0xff]  ;;  %v97_v33 = vld [vmem:[#allocation2 + $0xb8] sm:$0xff]  ;;  %v98_v34 = vld [vmem:[#allocation2 + $0xc0] sm:$0xff]  ;;  %v109_v37 = vpack.c.bf16 %v81_v29, %v80_v28  ;;  %v110_v38 = vpack.c.bf16 %v83_v31, %v82_v30 }
  0x54   :  { %1077 = vmatpush3.bf16.msra.mxu0 %v1243_v2  ;;  %1226 = vmatpush3.bf16.msra.mxu1 %v1243_v2  ;;  %v99_v35 = vld [vmem:[#allocation2 + $0xc8] sm:$0xff]  ;;  %v1251_v36 = vld [vmem:[#allocation7 + $0x10] sm:$0xff]   ;;  %v117_v39 = vpack.c.bf16 %v97_v33, %v96_v32  ;;  %v1252_v41 = vld [vmem:[#allocation7 + $0x18] sm:$0xff]  }
  0x55   :  { %1078 = vmatprep.subr.bf16.mxu0 %v1244_v3  ;;  %1219 = vmatprep.subr.bf16.mxu1 %v1244_v3  ;;  %v118_v40 = vpack.c.bf16 %v99_v35, %v98_v34  ;;  %v84_v42 = vld [vmem:[#allocation2 + $0x50] sm:$0xff]  ;;  %v85_v43 = vld [vmem:[#allocation2 + $0x58] sm:$0xff]  ;;  %v86_v44 = vld [vmem:[#allocation2 + $0x60] sm:$0xff] }
  0x56   :  { %v87_v45 = vld [vmem:[#allocation2 + $0x68] sm:$0xff]  ;;  %v100_v46 = vld [vmem:[#allocation2 + $0xd0] sm:$0xff]  ;;  %v101_v47 = vld [vmem:[#allocation2 + $0xd8] sm:$0xff]  ;;  %v111_v51 = vpack.c.bf16 %v85_v43, %v84_v42 }
  0x57   :  { %v102_v48 = vld [vmem:[#allocation2 + $0xe0] sm:$0xff]  ;;  %v103_v49 = vld [vmem:[#allocation2 + $0xe8] sm:$0xff]  ;;  %v112_v52 = vpack.c.bf16 %v87_v45, %v86_v44  ;;  %v119_v53 = vpack.c.bf16 %v101_v47, %v100_v46  ;;  %v88_v56 = vld [vmem:[#allocation2 + $0x70] sm:$0xff] }
  0x58   :  { %1079 = vmatpush3.bf16.msra.mxu0 %v1244_v3  ;;  %1227 = vmatpush3.bf16.msra.mxu1 %v1244_v3  ;;  %v1253_v50 = vld [vmem:[#allocation7 + $0x20] sm:$0xff]   ;;  %v120_v54 = vpack.c.bf16 %v103_v49, %v102_v48  ;;  %v1254_v55 = vld [vmem:[#allocation7 + $0x28] sm:$0xff]   ;;  %v89_v57 = vld [vmem:[#allocation2 + $0x78] sm:$0xff] }
  0x59   :  { %1080 = vmatprep.subr.bf16.mxu0 %v1245_v7  ;;  %1220 = vmatprep.subr.bf16.mxu1 %v1245_v7  ;;  %v104_v58 = vld [vmem:[#allocation2 + $0xf0] sm:$0xff]  ;;  %v105_v59 = vld [vmem:[#allocation2 + $0xf8] sm:$0xff]  ;;  %v113_v60 = vpack.c.bf16 %v89_v57, %v88_v56  ;;  %v1257_v0 = vld [vmem:[#allocation8] sm:$0xff]  }
  0x5a   :  { %v121_v61 = vpack.c.bf16 %v105_v59, %v104_v58  ;;  %v1255_v62 = vld [vmem:[#allocation7 + $0x30] sm:$0xff]   ;;  %v1256_v63 = vld [vmem:[#allocation7 + $0x38] sm:$0xff]   ;;  %v1258_v1 = vld [vmem:[#allocation8 + $0x8] sm:$0xff]  }
  0x5b   :  { %v1259_v2 = vld [vmem:[#allocation8 + $0x10] sm:$0xff]   ;;  %v1260_v3 = vld [vmem:[#allocation8 + $0x18] sm:$0xff]   ;;  %v1261_v4 = vld [vmem:[#allocation8 + $0x20] sm:$0xff]  }
  0x5c   :  { %1081 = vmatpush3.bf16.msra.mxu0 %v1245_v7  ;;  %1228 = vmatpush3.bf16.msra.mxu1 %v1245_v7  ;;  %v1262_v5 = vld [vmem:[#allocation8 + $0x28] sm:$0xff]  }
  0x5d   :  { %1082 = vmatprep.subr.bf16.mxu0 %v1246_v11  ;;  %1221 = vmatprep.subr.bf16.mxu1 %v1246_v11 }
  0x60   :  { %1083 = vmatpush3.bf16.msra.mxu0 %v1246_v11  ;;  %1229 = vmatpush3.bf16.msra.mxu1 %v1246_v11 }
  0x61   :  { %1084 = vmatprep.subr.bf16.mxu0 %v1247_v12  ;;  %1222 = vmatprep.subr.bf16.mxu1 %v1247_v12 }
  0x64   :  { %1085 = vmatpush3.bf16.msra.mxu0 %v1247_v12  ;;  %1230 = vmatpush3.bf16.msra.mxu1 %v1247_v12 }
  0x65   :  { %1086 = vmatprep.subr.bf16.mxu0 %v1248_v13  ;;  %1223 = vmatprep.subr.bf16.mxu1 %v1248_v13 }
  0x68   :  { %1087 = vmatpush3.bf16.msra.mxu0 %v1248_v13  ;;  %1231 = vmatpush3.bf16.msra.mxu1 %v1248_v13 }
  0x69   :  { %1120 = vmatprep.subr.bf16.mxu1 %v1249_v22  ;;  %1168 = vmatprep.subr.bf16.mxu0 %v1257_v0 }
  0x6b   :  { %1089 = vmatmul.mubr.bf16.vlgmr.msra.gmra.mrb[0].mxu0 %v107_v23  ;;  %1105 = vmatmul.mubr.bf16.vlgmr.msra.gmra.mrb[0].mxu1 %v115_v25 }
  0x6c   :  { %1092 = vmatprep.mubr.bf16.mxu0 %v108_v24  ;;  %1108 = vmatprep.mubr.bf16.mxu1 %v116_v26 }
  0x6d   :  { %1121 = vmatpush3.bf16.msra.mxu1 %v1249_v22  ;;  %1169 = vmatpush3.bf16.msra.mxu0 %v1257_v0 }
  0x6e   :  { %1122 = vmatprep.subr.bf16.mxu1 %v1250_v27  ;;  %1170 = vmatprep.subr.bf16.mxu0 %v1258_v1 }
  0x71   :  { %1123 = vmatpush3.bf16.msra.mxu1 %v1250_v27  ;;  %1171 = vmatpush3.bf16.msra.mxu0 %v1258_v1 }
  0x72   :  { %1124 = vmatprep.subr.bf16.mxu1 %v1251_v36  ;;  %1172 = vmatprep.subr.bf16.mxu0 %v1259_v2 }
  0x73   :  { %1093 = vmatmul.mubr.bf16.gmra.mrb[4].mxu0 %v109_v37  ;;  %1109 = vmatmul.mubr.bf16.gmra.mrb[4].mxu1 %v117_v39 }
  0x74   :  { %1096 = vmatprep.mubr.bf16.mxu0 %v110_v38  ;;  %1112 = vmatprep.mubr.bf16.mxu1 %v118_v40 }
  0x75   :  { %1125 = vmatpush3.bf16.msra.mxu1 %v1251_v36  ;;  %1173 = vmatpush3.bf16.msra.mxu0 %v1259_v2 }
  0x76   :  { %1126 = vmatprep.subr.bf16.mxu1 %v1252_v41  ;;  %1174 = vmatprep.subr.bf16.mxu0 %v1260_v3 }
  0x79   :  { %1127 = vmatpush3.bf16.msra.mxu1 %v1252_v41  ;;  %1175 = vmatpush3.bf16.msra.mxu0 %v1260_v3 }
  0x7a   :  { %1128 = vmatprep.subr.bf16.mxu1 %v1253_v50  ;;  %1176 = vmatprep.subr.bf16.mxu0 %v1261_v4 }
  0x7b   :  { %1097 = vmatmul.mubr.bf16.gmra.mrb[8].mxu0 %v111_v51  ;;  %1113 = vmatmul.mubr.bf16.gmra.mrb[8].mxu1 %v119_v53 }
  0x7c   :  { %1100 = vmatprep.mubr.bf16.mxu0 %v112_v52  ;;  %1116 = vmatprep.mubr.bf16.mxu1 %v120_v54 }
  0x7d   :  { %1129 = vmatpush3.bf16.msra.mxu1 %v1253_v50  ;;  %1177 = vmatpush3.bf16.msra.mxu0 %v1261_v4 }
  0x7e   :  { %1130 = vmatprep.subr.bf16.mxu1 %v1254_v55  ;;  %1178 = vmatprep.subr.bf16.mxu0 %v1262_v5 }
  0x81   :  { %1131 = vmatpush3.bf16.msra.mxu1 %v1254_v55  ;;  %1179 = vmatpush3.bf16.msra.mxu0 %v1262_v5 }
  0x82   :  { %1132 = vmatprep.subr.bf16.mxu1 %v1255_v62 }
  0x83   :  { %1101 = vmatmul.mubr.bf16.gmra.mrb[12].mxu0 %v113_v60  ;;  %1117 = vmatmul.mubr.bf16.gmra.mrb[12].mxu1 %v121_v61 }
  0x85   :  { %1133 = vmatpush3.bf16.msra.mxu1 %v1255_v62 }
  0x86   :  { %1134 = vmatprep.subr.bf16.mxu1 %v1256_v63 }
  0x89   :  { %1135 = vmatpush3.bf16.msra.mxu1 %v1256_v63 }
 0x13e   :  { %v1090_v6 = vpop.f32.mrb[0].mxu0  ;;  %v1106_v8 = vpop.f32.mrb[0].mxu1 }
 0x13f   :  { %v220_v7 = vpop.f32.mrb[1].mxu0  ;;  %v365_v10 = vmax.f32 %v1106_v8, 0.0  ;;  %v284_v11 = vpop.f32.mrb[1].mxu1  ;;  %v349_v12 = vmax.f32 %v1090_v6, 0.0 }
 0x140   :  { %v1091_v9 = vpop.f32.mrb[2].mxu0  ;;  %v363_v15 = vmax.f32 %v284_v11, 0.0  ;;  %v1107_v16 = vpop.f32.mrb[2].mxu1  ;;  %v347_v17 = vmax.f32 %v220_v7, 0.0 }
 0x141   :  { %v350_v13 = vmax.f32 %v1091_v9, 0.0  ;;  %v223_v14 = vpop.f32.mrb[3].mxu0  ;;  %v366_v19 = vmax.f32 %v1107_v16, 0.0  ;;  %v287_v20 = vpop.f32.mrb[3].mxu1 }
 0x142   :  { %v348_v18 = vmax.f32 %v223_v14, 0.0  ;;  %v364_v22 = vmax.f32 %v287_v20, 0.0 }
 0x143   :  { %v380_v21 = vpack.c.bf16 %v350_v13, %v349_v12  ;;  %v1484_v24 = vpack.c.bf16 %v366_v19, %v365_v10 }
 0x144   :  { %v379_v23 = vpack.c.bf16 %v348_v18, %v347_v17  ;;  %v1486_v25 = vpack.c.bf16 %v364_v22, %v363_v15  ;;  %v1263_v22 = vld [vmem:[#allocation8 + $0x30] sm:$0xff]  }
 0x145   :  { %1180 = vmatprep.subr.bf16.mxu0 %v1263_v22 }
 0x146   :  { %v1094_v26 = vpop.f32.mrb[4].mxu0  ;;  %1136 = vmatprep.mubr.bf16.mxu1 %v379_v23  ;;  %v1110_v28 = vpop.f32.mrb[4].mxu1  ;;  %1181 = vmatpush3.bf16.msra.mxu0 %v1263_v22  ;;  %v1264_v23 = vld [vmem:[#allocation8 + $0x38] sm:$0xff]  }
 0x147   :  { %v236_v27 = vpop.f32.mrb[5].mxu0  ;;  %1137 = vmatmul.mubr.bf16.vlgmr.msra.gmra.mrb[16].mxu1 %v380_v21  ;;  %v369_v30 = vmax.f32 %v1110_v28, 0.0  ;;  %v300_v31 = vpop.f32.mrb[5].mxu1  ;;  %v353_v32 = vmax.f32 %v1094_v26, 0.0  ;;  %1182 = vmatprep.subr.bf16.mxu0 %v1264_v23 }
 0x148   :  { %v1095_v29 = vpop.f32.mrb[6].mxu0  ;;  %v367_v35 = vmax.f32 %v300_v31, 0.0  ;;  %v1111_v36 = vpop.f32.mrb[6].mxu1  ;;  %v351_v37 = vmax.f32 %v236_v27, 0.0 }
 0x149   :  { %v354_v33 = vmax.f32 %v1095_v29, 0.0  ;;  %v239_v34 = vpop.f32.mrb[7].mxu0  ;;  %v370_v39 = vmax.f32 %v1111_v36, 0.0  ;;  %v303_v40 = vpop.f32.mrb[7].mxu1 }
 0x14a   :  { %v352_v38 = vmax.f32 %v239_v34, 0.0  ;;  %v368_v42 = vmax.f32 %v303_v40, 0.0  ;;  %1183 = vmatpush3.bf16.msra.mxu0 %v1264_v23 }
 0x14b   :  { %v382_v41 = vpack.c.bf16 %v354_v33, %v353_v32  ;;  %v390_v44 = vpack.c.bf16 %v370_v39, %v369_v30 }
 0x14c   :  { %v381_v43 = vpack.c.bf16 %v352_v38, %v351_v37  ;;  %v389_v45 = vpack.c.bf16 %v368_v42, %v367_v35 }
 0x14e   :  { %v1098_v46 = vpop.f32.mrb[8].mxu0  ;;  %1140 = vmatprep.mubr.bf16.mxu1 %v381_v43  ;;  %v1114_v48 = vpop.f32.mrb[8].mxu1 }
 0x14f   :  { %v252_v47 = vpop.f32.mrb[9].mxu0  ;;  %1141 = vmatmul.mubr.bf16.gmra.mrb[20].mxu1 %v382_v41  ;;  %v373_v50 = vmax.f32 %v1114_v48, 0.0  ;;  %v316_v51 = vpop.f32.mrb[9].mxu1  ;;  %v357_v52 = vmax.f32 %v1098_v46, 0.0 }
 0x150   :  { %v1099_v49 = vpop.f32.mrb[10].mxu0  ;;  %v371_v55 = vmax.f32 %v316_v51, 0.0  ;;  %v1115_v56 = vpop.f32.mrb[10].mxu1  ;;  %v355_v57 = vmax.f32 %v252_v47, 0.0 }
 0x151   :  { %v358_v53 = vmax.f32 %v1099_v49, 0.0  ;;  %v255_v54 = vpop.f32.mrb[11].mxu0  ;;  %v374_v59 = vmax.f32 %v1115_v56, 0.0  ;;  %v319_v60 = vpop.f32.mrb[11].mxu1 }
 0x152   :  { %v356_v58 = vmax.f32 %v255_v54, 0.0  ;;  %v372_v62 = vmax.f32 %v319_v60, 0.0 }
 0x153   :  { %v384_v61 = vpack.c.bf16 %v358_v53, %v357_v52  ;;  %v392_v0 = vpack.c.bf16 %v374_v59, %v373_v50 }
 0x154   :  { %v383_v63 = vpack.c.bf16 %v356_v58, %v355_v57  ;;  %v391_v1 = vpack.c.bf16 %v372_v62, %v371_v55 }
 0x156   :  { %v1102_v2 = vpop.f32.mrb[12].mxu0  ;;  %1144 = vmatprep.mubr.bf16.mxu1 %v383_v63  ;;  %v1118_v4 = vpop.f32.mrb[12].mxu1 }
 0x157   :  { %v268_v3 = vpop.f32.mrb[13].mxu0  ;;  %1145 = vmatmul.mubr.bf16.gmra.mrb[24].mxu1 %v384_v61  ;;  %v377_v6 = vmax.f32 %v1118_v4, 0.0  ;;  %v332_v7 = vpop.f32.mrb[13].mxu1  ;;  %v361_v8 = vmax.f32 %v1102_v2, 0.0 }
 0x158   :  { %v1103_v5 = vpop.f32.mrb[14].mxu0  ;;  %v375_v11 = vmax.f32 %v332_v7, 0.0  ;;  %v1119_v12 = vpop.f32.mrb[14].mxu1  ;;  %v359_v13 = vmax.f32 %v268_v3, 0.0 }
 0x159   :  { %v362_v9 = vmax.f32 %v1103_v5, 0.0  ;;  %v271_v10 = vpop.f32.mrb[15].mxu0  ;;  %v378_v15 = vmax.f32 %v1119_v12, 0.0  ;;  %v335_v16 = vpop.f32.mrb[15].mxu1 }
 0x15a   :  { %v360_v14 = vmax.f32 %v271_v10, 0.0  ;;  %v376_v18 = vmax.f32 %v335_v16, 0.0 }
 0x15b   :  { %v386_v17 = vpack.c.bf16 %v362_v9, %v361_v8  ;;  %v394_v20 = vpack.c.bf16 %v378_v15, %v377_v6 }
 0x15c   :  { %v385_v19 = vpack.c.bf16 %v360_v14, %v359_v13  ;;  %v393_v21 = vpack.c.bf16 %v376_v18, %v375_v11 }
 0x15e   :  { %1148 = vmatprep.mubr.bf16.mxu1 %v385_v19 }
 0x15f   :  { %1149 = vmatmul.mubr.bf16.gmra.mrb[28].mxu1 %v386_v17 }
 0x160   :  { %1152 = vmatprep.mubr.bf16.mxu1 %v1486_v25 }
 0x167   :  { %1153 = vmatmul.mubr.bf16.gmra.mrb[32].mxu1 %v1484_v24 }
 0x168   :  { %1156 = vmatprep.mubr.bf16.mxu1 %v389_v45 }
 0x16f   :  { %1157 = vmatmul.mubr.bf16.gmra.mrb[36].mxu1 %v390_v44 }
 0x170   :  { %1160 = vmatprep.mubr.bf16.mxu1 %v391_v1 }
 0x177   :  { %1161 = vmatmul.mubr.bf16.gmra.mrb[40].mxu1 %v392_v0 }
 0x178   :  { %1164 = vmatprep.mubr.bf16.mxu1 %v393_v21 }
 0x17f   :  { %1165 = vmatmul.mubr.bf16.gmra.mrb[44].mxu1 %v394_v20 }
 0x21a   :  { %v1138_v26 = vpop.f32.mrb[16].mxu1 }
 0x21b   :  { %v493_v27 = vpop.f32.mrb[17].mxu1  ;;  %v622_v29 = vmax.f32 %v1138_v26, 0.0 }
 0x21c   :  { %v1139_v28 = vpop.f32.mrb[18].mxu1  ;;  %v620_v31 = vmax.f32 %v493_v27, 0.0 }
 0x21d   :  { %v623_v30 = vmax.f32 %v1139_v28, 0.0  ;;  %v496_v25 = vpop.f32.mrb[19].mxu1 }
 0x21e   :  { %v621_v24 = vmax.f32 %v496_v25, 0.0 }
 0x21f   :  { %v653_v32 = vpack.c.bf16 %v623_v30, %v622_v29 }
 0x220   :  { %v652_v33 = vpack.c.bf16 %v621_v24, %v620_v31 }
 0x222   :  { %v1142_v34 = vpop.f32.mrb[20].mxu1  ;;  %1184 = vmatprep.mubr.bf16.mxu0 %v652_v33 }
 0x223   :  { %v509_v35 = vpop.f32.mrb[21].mxu1  ;;  %1185 = vmatmul.mubr.bf16.vlgmr.msra.gmra.mrb[16].mxu0 %v653_v32  ;;  %v626_v37 = vmax.f32 %v1142_v34, 0.0 }
 0x224   :  { %v1143_v36 = vpop.f32.mrb[22].mxu1  ;;  %v624_v40 = vmax.f32 %v509_v35, 0.0 }
 0x225   :  { %v627_v38 = vmax.f32 %v1143_v36, 0.0  ;;  %v512_v39 = vpop.f32.mrb[23].mxu1 }
 0x226   :  { %v625_v41 = vmax.f32 %v512_v39, 0.0 }
 0x227   :  { %v655_v42 = vpack.c.bf16 %v627_v38, %v626_v37 }
 0x228   :  { %v654_v43 = vpack.c.bf16 %v625_v41, %v624_v40 }
 0x22a   :  { %v1146_v44 = vpop.f32.mrb[24].mxu1  ;;  %1188 = vmatprep.mubr.bf16.mxu0 %v654_v43 }
 0x22b   :  { %v525_v45 = vpop.f32.mrb[25].mxu1  ;;  %1189 = vmatmul.mubr.bf16.gmra.mrb[20].mxu0 %v655_v42  ;;  %v630_v47 = vmax.f32 %v1146_v44, 0.0 }
 0x22c   :  { %v1147_v46 = vpop.f32.mrb[26].mxu1  ;;  %v628_v50 = vmax.f32 %v525_v45, 0.0 }
 0x22d   :  { %v631_v48 = vmax.f32 %v1147_v46, 0.0  ;;  %v528_v49 = vpop.f32.mrb[27].mxu1 }
 0x22e   :  { %v629_v51 = vmax.f32 %v528_v49, 0.0 }
 0x22f   :  { %v657_v52 = vpack.c.bf16 %v631_v48, %v630_v47 }
 0x230   :  { %v656_v53 = vpack.c.bf16 %v629_v51, %v628_v50 }
 0x232   :  { %v1150_v54 = vpop.f32.mrb[28].mxu1  ;;  %1192 = vmatprep.mubr.bf16.mxu0 %v656_v53 }
 0x233   :  { %v541_v55 = vpop.f32.mrb[29].mxu1  ;;  %1193 = vmatmul.mubr.bf16.gmra.mrb[24].mxu0 %v657_v52  ;;  %v634_v57 = vmax.f32 %v1150_v54, 0.0 }
 0x234   :  { %v1151_v56 = vpop.f32.mrb[30].mxu1  ;;  %v632_v60 = vmax.f32 %v541_v55, 0.0 }
 0x235   :  { %v635_v58 = vmax.f32 %v1151_v56, 0.0  ;;  %v544_v59 = vpop.f32.mrb[31].mxu1 }
 0x236   :  { %v633_v61 = vmax.f32 %v544_v59, 0.0 }
 0x237   :  { %v659_v62 = vpack.c.bf16 %v635_v58, %v634_v57 }
 0x238   :  { %v658_v63 = vpack.c.bf16 %v633_v61, %v632_v60 }
 0x23a   :  { %v1154_v0 = vpop.f32.mrb[32].mxu1  ;;  %1196 = vmatprep.mubr.bf16.mxu0 %v658_v63 }
 0x23b   :  { %v557_v1 = vpop.f32.mrb[33].mxu1  ;;  %1197 = vmatmul.mubr.bf16.gmra.mrb[28].mxu0 %v659_v62  ;;  %v638_v3 = vmax.f32 %v1154_v0, 0.0 }
 0x23c   :  { %v1155_v2 = vpop.f32.mrb[34].mxu1  ;;  %v636_v6 = vmax.f32 %v557_v1, 0.0 }
 0x23d   :  { %v639_v4 = vmax.f32 %v1155_v2, 0.0  ;;  %v560_v5 = vpop.f32.mrb[35].mxu1 }
 0x23e   :  { %v637_v7 = vmax.f32 %v560_v5, 0.0 }
 0x23f   :  { %v661_v8 = vpack.c.bf16 %v639_v4, %v638_v3 }
 0x240   :  { %v660_v9 = vpack.c.bf16 %v637_v7, %v636_v6 }
 0x242   :  { %v1158_v10 = vpop.f32.mrb[36].mxu1  ;;  %1200 = vmatprep.mubr.bf16.mxu0 %v660_v9 }
 0x243   :  { %v573_v11 = vpop.f32.mrb[37].mxu1  ;;  %1201 = vmatmul.mubr.bf16.gmra.mrb[32].mxu0 %v661_v8  ;;  %v642_v13 = vmax.f32 %v1158_v10, 0.0 }
 0x244   :  { %v1159_v12 = vpop.f32.mrb[38].mxu1  ;;  %v640_v16 = vmax.f32 %v573_v11, 0.0 }
 0x245   :  { %v643_v14 = vmax.f32 %v1159_v12, 0.0  ;;  %v576_v15 = vpop.f32.mrb[39].mxu1 }
 0x246   :  { %v641_v17 = vmax.f32 %v576_v15, 0.0 }
 0x247   :  { %v663_v18 = vpack.c.bf16 %v643_v14, %v642_v13 }
 0x248   :  { %v662_v19 = vpack.c.bf16 %v641_v17, %v640_v16 }
 0x24a   :  { %v1162_v20 = vpop.f32.mrb[40].mxu1  ;;  %1204 = vmatprep.mubr.bf16.mxu0 %v662_v19 }
 0x24b   :  { %v589_v21 = vpop.f32.mrb[41].mxu1  ;;  %1205 = vmatmul.mubr.bf16.gmra.mrb[36].mxu0 %v663_v18  ;;  %v646_v23 = vmax.f32 %v1162_v20, 0.0 }
 0x24c   :  { %v1163_v22 = vpop.f32.mrb[42].mxu1  ;;  %v644_v28 = vmax.f32 %v589_v21, 0.0 }
 0x24d   :  { %v647_v26 = vmax.f32 %v1163_v22, 0.0  ;;  %v592_v27 = vpop.f32.mrb[43].mxu1 }
 0x24e   :  { %v645_v29 = vmax.f32 %v592_v27, 0.0 }
 0x24f   :  { %v665_v30 = vpack.c.bf16 %v647_v26, %v646_v23 }
 0x250   :  { %v664_v25 = vpack.c.bf16 %v645_v29, %v644_v28 }
 0x252   :  { %v1166_v31 = vpop.f32.mrb[44].mxu1  ;;  %1208 = vmatprep.mubr.bf16.mxu0 %v664_v25 }
 0x253   :  { %v605_v24 = vpop.f32.mrb[45].mxu1  ;;  %1209 = vmatmul.mubr.bf16.gmra.mrb[40].mxu0 %v665_v30  ;;  %v650_v33 = vmax.f32 %v1166_v31, 0.0 }
 0x254   :  { %v1167_v32 = vpop.f32.mrb[46].mxu1  ;;  %v648_v36 = vmax.f32 %v605_v24, 0.0 }
 0x255   :  { %v651_v34 = vmax.f32 %v1167_v32, 0.0  ;;  %v608_v35 = vpop.f32.mrb[47].mxu1 }
 0x256   :  { %v649_v37 = vmax.f32 %v608_v35, 0.0 }
 0x257   :  { %v667_v38 = vpack.c.bf16 %v651_v34, %v650_v33 }
 0x258   :  { %v666_v39 = vpack.c.bf16 %v649_v37, %v648_v36 }
 0x25a   :  { %1212 = vmatprep.mubr.bf16.mxu0 %v666_v39 }
 0x25b   :  { %1213 = vmatmul.mubr.bf16.gmra.mrb[44].mxu0 %v667_v38 }
 0x2f6   :  { %v1186_v40 = vpop.f32.mrb[16].mxu0 }
 0x2f7   :  { %v895_v41 = vmax.f32 %v1186_v40, 0.0  ;;  %v766_v42 = vpop.f32.mrb[17].mxu0 }
 0x2f8   :  { %v893_v43 = vmax.f32 %v766_v42, 0.0  ;;  %v1187_v44 = vpop.f32.mrb[18].mxu0 }
 0x2f9   :  { %927 = vst [vmem:[#allocation10 + $0x10] sm:$0xff] %v895_v41  ;;  %v896_v45 = vmax.f32 %v1187_v44, 0.0  ;;  %v769_v46 = vpop.f32.mrb[19].mxu0 }
 0x2fa   :  { %925 = vst [vmem:[#allocation10] sm:$0xff] %v893_v43  ;;  %v894_v47 = vmax.f32 %v769_v46, 0.0 }
 0x2fb   :  { %928 = vst [vmem:[#allocation10 + $0x18] sm:$0xff] %v896_v45 }
 0x2fc   :  { %926 = vst [vmem:[#allocation10 + $0x8] sm:$0xff] %v894_v47 }
 0x2fe   :  { %v1190_v48 = vpop.f32.mrb[20].mxu0 }
 0x2ff   :  { %v899_v49 = vmax.f32 %v1190_v48, 0.0  ;;  %v782_v50 = vpop.f32.mrb[21].mxu0 }
 0x300   :  { %v897_v51 = vmax.f32 %v782_v50, 0.0  ;;  %v1191_v52 = vpop.f32.mrb[22].mxu0 }
 0x301   :  { %931 = vst [vmem:[#allocation10 + $0x30] sm:$0xff] %v899_v49  ;;  %v900_v53 = vmax.f32 %v1191_v52, 0.0  ;;  %v785_v54 = vpop.f32.mrb[23].mxu0 }
 0x302   :  { %929 = vst [vmem:[#allocation10 + $0x20] sm:$0xff] %v897_v51  ;;  %v898_v55 = vmax.f32 %v785_v54, 0.0 }
 0x303   :  { %932 = vst [vmem:[#allocation10 + $0x38] sm:$0xff] %v900_v53 }
 0x304   :  { %930 = vst [vmem:[#allocation10 + $0x28] sm:$0xff] %v898_v55 }
 0x306   :  { %v1194_v56 = vpop.f32.mrb[24].mxu0 }
 0x307   :  { %v903_v57 = vmax.f32 %v1194_v56, 0.0  ;;  %v798_v58 = vpop.f32.mrb[25].mxu0 }
 0x308   :  { %v901_v59 = vmax.f32 %v798_v58, 0.0  ;;  %v1195_v60 = vpop.f32.mrb[26].mxu0 }
 0x309   :  { %935 = vst [vmem:[#allocation10 + $0x50] sm:$0xff] %v903_v57  ;;  %v904_v61 = vmax.f32 %v1195_v60, 0.0  ;;  %v801_v62 = vpop.f32.mrb[27].mxu0 }
 0x30a   :  { %933 = vst [vmem:[#allocation10 + $0x40] sm:$0xff] %v901_v59  ;;  %v902_v63 = vmax.f32 %v801_v62, 0.0 }
 0x30b   :  { %936 = vst [vmem:[#allocation10 + $0x58] sm:$0xff] %v904_v61 }
 0x30c   :  { %934 = vst [vmem:[#allocation10 + $0x48] sm:$0xff] %v902_v63 }
 0x30e   :  { %v1198_v0 = vpop.f32.mrb[28].mxu0 }
 0x30f   :  { %v907_v1 = vmax.f32 %v1198_v0, 0.0  ;;  %v814_v2 = vpop.f32.mrb[29].mxu0 }
 0x310   :  { %v905_v3 = vmax.f32 %v814_v2, 0.0  ;;  %v1199_v4 = vpop.f32.mrb[30].mxu0 }
 0x311   :  { %939 = vst [vmem:[#allocation10 + $0x70] sm:$0xff] %v907_v1  ;;  %v908_v5 = vmax.f32 %v1199_v4, 0.0  ;;  %v817_v6 = vpop.f32.mrb[31].mxu0 }
 0x312   :  { %937 = vst [vmem:[#allocation10 + $0x60] sm:$0xff] %v905_v3  ;;  %v906_v7 = vmax.f32 %v817_v6, 0.0 }
 0x313   :  { %940 = vst [vmem:[#allocation10 + $0x78] sm:$0xff] %v908_v5 }
 0x314   :  { %938 = vst [vmem:[#allocation10 + $0x68] sm:$0xff] %v906_v7 }
 0x316   :  { %v1202_v8 = vpop.f32.mrb[32].mxu0 }
 0x317   :  { %v911_v9 = vmax.f32 %v1202_v8, 0.0  ;;  %v830_v10 = vpop.f32.mrb[33].mxu0 }
 0x318   :  { %v909_v11 = vmax.f32 %v830_v10, 0.0  ;;  %v1203_v12 = vpop.f32.mrb[34].mxu0 }
 0x319   :  { %943 = vst [vmem:[#allocation10 + $0x90] sm:$0xff] %v911_v9  ;;  %v912_v13 = vmax.f32 %v1203_v12, 0.0  ;;  %v833_v14 = vpop.f32.mrb[35].mxu0 }
 0x31a   :  { %941 = vst [vmem:[#allocation10 + $0x80] sm:$0xff] %v909_v11  ;;  %v910_v15 = vmax.f32 %v833_v14, 0.0 }
 0x31b   :  { %944 = vst [vmem:[#allocation10 + $0x98] sm:$0xff] %v912_v13 }
 0x31c   :  { %942 = vst [vmem:[#allocation10 + $0x88] sm:$0xff] %v910_v15 }
 0x31e   :  { %v1206_v16 = vpop.f32.mrb[36].mxu0 }
 0x31f   :  { %v915_v17 = vmax.f32 %v1206_v16, 0.0  ;;  %v846_v18 = vpop.f32.mrb[37].mxu0 }
 0x320   :  { %v913_v19 = vmax.f32 %v846_v18, 0.0  ;;  %v1207_v20 = vpop.f32.mrb[38].mxu0 }
 0x321   :  { %947 = vst [vmem:[#allocation10 + $0xb0] sm:$0xff] %v915_v17  ;;  %v916_v21 = vmax.f32 %v1207_v20, 0.0  ;;  %v849_v22 = vpop.f32.mrb[39].mxu0 }
 0x322   :  { %945 = vst [vmem:[#allocation10 + $0xa0] sm:$0xff] %v913_v19  ;;  %v914_v23 = vmax.f32 %v849_v22, 0.0 }
 0x323   :  { %948 = vst [vmem:[#allocation10 + $0xb8] sm:$0xff] %v916_v21 }
 0x324   :  { %946 = vst [vmem:[#allocation10 + $0xa8] sm:$0xff] %v914_v23 }
 0x326   :  { %v1210_v26 = vpop.f32.mrb[40].mxu0 }
 0x327   :  { %v919_v27 = vmax.f32 %v1210_v26, 0.0  ;;  %v862_v28 = vpop.f32.mrb[41].mxu0 }
 0x328   :  { %v917_v29 = vmax.f32 %v862_v28, 0.0  ;;  %v1211_v30 = vpop.f32.mrb[42].mxu0 }
 0x329   :  { %951 = vst [vmem:[#allocation10 + $0xd0] sm:$0xff] %v919_v27  ;;  %v920_v25 = vmax.f32 %v1211_v30, 0.0  ;;  %v865_v31 = vpop.f32.mrb[43].mxu0 }
 0x32a   :  { %949 = vst [vmem:[#allocation10 + $0xc0] sm:$0xff] %v917_v29  ;;  %v918_v24 = vmax.f32 %v865_v31, 0.0 }
 0x32b   :  { %952 = vst [vmem:[#allocation10 + $0xd8] sm:$0xff] %v920_v25 }
 0x32c   :  { %950 = vst [vmem:[#allocation10 + $0xc8] sm:$0xff] %v918_v24 }
 0x32e   :  { %v1214_v32 = vpop.f32.mrb[44].mxu0 }
 0x32f   :  { %v923_v33 = vmax.f32 %v1214_v32, 0.0  ;;  %v878_v34 = vpop.f32.mrb[45].mxu0 }
 0x330   :  { %v921_v35 = vmax.f32 %v878_v34, 0.0  ;;  %v1215_v36 = vpop.f32.mrb[46].mxu0 }
 0x331   :  { %955 = vst [vmem:[#allocation10 + $0xf0] sm:$0xff] %v923_v33  ;;  %v924_v37 = vmax.f32 %v1215_v36, 0.0  ;;  %v881_v38 = vpop.f32.mrb[47].mxu0 }
 0x332   :  { %953 = vst [vmem:[#allocation10 + $0xe0] sm:$0xff] %v921_v35  ;;  %v922_v39 = vmax.f32 %v881_v38, 0.0 }
 0x333   :  { %956 = vst [vmem:[#allocation10 + $0xf8] sm:$0xff] %v924_v37 }
 0x334   :  { %954 = vst [vmem:[#allocation10 + $0xe8] sm:$0xff] %v922_v39 }
 0x335   :  { %1364 = shalt.err (!%p1361_p8)
}
 0x336   :  { %s1365_s17 = scalar_lea.hbm %s1509_s4, 4096 }
 0x337   :  { %p1366_p9 = scmp.ne.s32.totalorder %s1509_s4, %s1365_s17  ;;  %p1369_p10 = scmp.lt.u32.totalorder %s1365_s17, %s1509_s4 }
 0x339   :  { %p1371_p11 = pnand %p1369_p10, %p1366_p9 }
 0x33b   :  { %1374 = shalt.err (!%p1371_p11)
}
 0x33c   :  { %968 = dma.vmem_to_hbm [thread:$0]  %s963_s25, 4096, %s1509_s4, [#allocation4], %s1387_s1, %s1387_s1, %s1388_s13  }
 0x33d   :  { %1381 = dma.done.wait [#allocation4], 4096  }
 0x33e   :  { %1382 = vsyncadd [#allocation4], 4294963200 }
 0x33f   :  { %972 = vsyncpa [#allocation3], 1 }
 0x340   :  { %973 = vsyncpa [#allocation6], 1 }
 0x341   :  { %974 = vsyncpa [#allocation9], 1 }
 0x342   :  { %975 = vsyncpa [#allocation4], 1 }

</bundles_post_ra>
